<compile_context>
chip_gen: v7x
topology: tpu7x:2x2x1
jax: 0.10.0
libtpu: 0.0.40
codegen_flags: <defaults>
</compile_context>

<pallas_src>
import functools
import math

import jax
import jax.numpy as jnp
from jax.experimental import pallas as pl
from jax.experimental.pallas import tpu as pltpu

_LANES = 128
_MAX_TILE_ROWS = 1024  # 1024 x 128 x 4 B = 512 KiB per input block (safe on v5e/v6e/v7x)


def _bce_ones_kernel(p_ref, out_ref, acc_ref, *, inv_n):
    """Accumulates sum over all elements of BCE(p, target=1) = min(-log(p), 100)."""
    i = pl.program_id(0)

    @pl.when(i == 0)
    def _():
        acc_ref[...] = jnp.zeros_like(acc_ref)

    p = p_ref[...]  # f32, lane-dense (tile_r, 128)
    # nn.BCELoss clamps log() at -100  ->  per-element loss = min(-log(p), 100).
    acc_ref[...] += jnp.minimum(-jnp.log(p), 100.0)

    @pl.when(i == pl.num_programs(0) - 1)
    def _():
        # Single cross-lane/sublane reduction + mean scaling, done once.
        out_ref[0, 0] = jnp.sum(acc_ref[...]) * inv_n


def bce_loss_with_ones(preds):
    """mean(BCE(preds, 1)) over all elements, as one lane-dense Pallas reduction."""
    # TODO(synk): training use under jax.grad would need a jax.custom_vjp
    # (d_preds = -1/(n*preds) * g); only the forward pass is implemented here.
    n = preds.size
    flat = preds.reshape(-1).astype(jnp.float32)

    # Lane-dense layout: last dim = 128 lanes, rows padded to a multiple of 8.
    rows = math.ceil(n / _LANES)
    rows = math.ceil(rows / 8) * 8
    if rows > _MAX_TILE_ROWS:
        tile_r = _MAX_TILE_ROWS
        rows = math.ceil(rows / tile_r) * tile_r
    else:
        tile_r = rows
    grid = (rows // tile_r,)

    padded_n = rows * _LANES
    if padded_n != n:
        # Pad with 1.0: BCE(1.0, target=1) = -log(1) = 0 -> no bias in the sum.
        flat = jnp.concatenate([flat, jnp.ones((padded_n - n,), jnp.float32)])
    slab = flat.reshape(rows, _LANES)

    kernel = functools.partial(_bce_ones_kernel, inv_n=1.0 / n)

    out = pl.pallas_call(
        kernel,
        out_shape=jax.ShapeDtypeStruct((1, 1), jnp.float32),
        grid=grid,
        in_specs=[pl.BlockSpec((tile_r, _LANES), lambda i: (i, 0))],
        out_specs=pl.BlockSpec(memory_space=pltpu.MemorySpace.SMEM),
        scratch_shapes=[pltpu.VMEM((tile_r, _LANES), jnp.float32)],
        compiler_params=pltpu.CompilerParams(
            dimension_semantics=("arbitrary",)  # accumulating reduction axis
        ),
        cost_estimate=pl.CostEstimate(
            flops=2 * n, transcendentals=n, bytes_accessed=4 * padded_n
        ),
    )(slab)
    return out[0, 0]


def adversarial_loss_forward(real_X, level, gen, disc):
    """Forward of the PyTorch AdversarialLoss module (device move is a no-op in JAX)."""
    fake_Y = gen(real_X, level)
    preds = disc(fake_Y, level)
    loss = bce_loss_with_ones(preds)
    return loss, fake_Y


# ---- deterministic JAX stand-ins for the externally injected gen / disc ----
# TODO(synk): the real generator/discriminator are external nn.Modules with no
# definition in the spec; these stand-ins only provide shapes / value ranges.
def make_standin_gen(key, channels):
    w = 0.1 * jax.random.normal(key, (channels, channels), dtype=jnp.float32)

    def gen(x, level):
        del level  # stand-in ignores the progressive-growing level
        return jnp.tanh(jnp.einsum("nchw,cd->ndhw", x, w))

    return gen


def make_standin_disc(key, channels):
    w = jax.random.normal(key, (channels,), dtype=jnp.float32)

    def disc(y, level):
        del level
        logits = jnp.einsum("nchw,c->nhw", y, w)
        return jax.nn.sigmoid(logits)[:, None, :, :]  # (N, 1, H, W) patch preds in (0,1)

    return disc


if __name__ == "__main__":
    key = jax.random.PRNGKey(0)
    k_x, k_g, k_d = jax.random.split(key, 3)

    N, C, H, W = 2, 4, 16, 16
    real_X = jax.random.normal(k_x, (N, C, H, W), dtype=jnp.float32)
    level = 0

    gen = make_standin_gen(k_g, C)
    disc = make_standin_disc(k_d, C)

    loss, fake_Y = adversarial_loss_forward(real_X, level, gen, disc)
    loss = jax.block_until_ready(loss)
    fake_Y = jax.block_until_ready(fake_Y)

    # Pure-JAX reference with the same BCE(target=1) semantics as nn.BCELoss.
    preds_ref = disc(gen(real_X, level), level)
    loss_ref = jnp.mean(jnp.minimum(-jnp.log(preds_ref), 100.0))
    assert jnp.allclose(loss, loss_ref, rtol=1e-5, atol=1e-5), (loss, loss_ref)
    assert fake_Y.shape == (N, C, H, W)
    assert jnp.isfinite(loss)

    print("KERNEL_OK")
</pallas_src>

<mosaic_0001>
module attributes {stable_mosaic.version = 11 : i64} {
  func.func @_bce_ones_kernel(%arg0: i32, %arg1: memref<8x128xf32, #tpu.memory_space<vmem>>, %arg2: memref<1x1xf32, #tpu.memory_space<smem>>, %arg3: memref<8x128xf32, #tpu.memory_space<vmem>>) attributes {dimension_semantics = [#tpu.dimension_semantics<arbitrary>], iteration_bounds = array<i64: 1>, scalar_prefetch = 0 : i64, scratch_operands = 1 : i64, tpu.core_type = #tpu.core_type<tc>, window_params = [{transform_indices = @transform_0, window_bounds = array<i64: 8, 128>}, {transform_indices = @transform_1, window_bounds = array<i64: 1, 1>}]} {
    %c0_i32 = arith.constant 0 : i32
    %0 = arith.cmpi eq, %arg0, %c0_i32 : i32
    %1 = arith.extui %0 : i1 to i32
    %c0_i32_0 = arith.constant 0 : i32
    %2 = arith.cmpi ne, %1, %c0_i32_0 : i32
    scf.if %2 {
      %cst_9 = arith.constant 0.000000e+00 : f32
      %15 = vector.broadcast %cst_9 : f32 to vector<8x128xf32>
      %c0_10 = arith.constant 0 : index
      %c0_11 = arith.constant 0 : index
      %16 = vector.load %arg3[%c0_10, %c0_11] : memref<8x128xf32, #tpu.memory_space<vmem>>, vector<8x128xf32>
      tpu.vector_store %arg3[%c0_10, %c0_11], %15 {strides = array<i32>} : memref<8x128xf32, #tpu.memory_space<vmem>>, vector<8x128xf32>,
    } else {
    }
    %c0 = arith.constant 0 : index
    %c0_1 = arith.constant 0 : index
    %3 = vector.load %arg1[%c0, %c0_1] : memref<8x128xf32, #tpu.memory_space<vmem>>, vector<8x128xf32>
    %c0_2 = arith.constant 0 : index
    %c0_3 = arith.constant 0 : index
    %4 = vector.load %arg3[%c0_2, %c0_3] : memref<8x128xf32, #tpu.memory_space<vmem>>, vector<8x128xf32>
    %5 = math.log %3 : vector<8x128xf32>
    %cst = arith.constant 0.000000e+00 : f32
    %6 = vector.broadcast %cst : f32 to vector<8x128xf32>
    %7 = arith.subf %6, %5 : vector<8x128xf32>
    %cst_4 = arith.constant 1.000000e+02 : f32
    %8 = vector.broadcast %cst_4 : f32 to vector<8x128xf32>
    %9 = arith.minimumf %7, %8 : vector<8x128xf32>
    %10 = arith.addf %4, %9 : vector<8x128xf32>
    %c0_5 = arith.constant 0 : index
    %c0_6 = arith.constant 0 : index
    %11 = vector.load %arg3[%c0_5, %c0_6] : memref<8x128xf32, #tpu.memory_space<vmem>>, vector<8x128xf32>
    tpu.vector_store %arg3[%c0_5, %c0_6], %10 {strides = array<i32>} : memref<8x128xf32, #tpu.memory_space<vmem>>, vector<8x128xf32>,
    %c0_i32_7 = arith.constant 0 : i32
    %12 = arith.cmpi eq, %arg0, %c0_i32_7 : i32
    %13 = arith.extui %12 : i1 to i32
    %c0_i32_8 = arith.constant 0 : i32
    %14 = arith.cmpi ne, %13, %c0_i32_8 : i32
    scf.if %14 {
      %c0_9 = arith.constant 0 : index
      %c0_10 = arith.constant 0 : index
      %15 = vector.load %arg3[%c0_9, %c0_10] : memref<8x128xf32, #tpu.memory_space<vmem>>, vector<8x128xf32>
      %16 = vector.shape_cast %15 : vector<8x128xf32> to vector<1x8x128xf32>
      %cst_11 = arith.constant dense<0.000000e+00> : vector<1xf32>
      %17 = vector.multi_reduction <add>, %16, %cst_11 [1, 2] : vector<1x8x128xf32> to vector<1xf32>
      %18 = vector.shape_cast %17 : vector<1xf32> to vector<1x1x1xf32>
      %19 = vector.extract %18[0, 0, 0] : f32 from vector<1x1x1xf32>
      %cst_12 = arith.constant 0.001953125 : f32
      %20 = arith.mulf %19, %cst_12 : f32
      %c0_13 = arith.constant 0 : index
      %c0_14 = arith.constant 0 : index
      %21 = memref.load %arg2[%c0_13, %c0_14] : memref<1x1xf32, #tpu.memory_space<smem>>
      memref.store %20, %arg2[%c0_13, %c0_14] : memref<1x1xf32, #tpu.memory_space<smem>>
    } else {
    }
    return
  }
  func.func @transform_0(%arg0: i32) -> (i32, i32) {
    %c0_i32 = arith.constant 0 : i32
    %c0_i32_0 = arith.constant 0 : i32
    return %arg0, %c0_i32 : i32, i32
  }
  func.func @transform_1(%arg0: i32) -> (i32, i32) {
    %c0_i32 = arith.constant 0 : i32
    %c0_i32_0 = arith.constant 0 : i32
    %c0_i32_1 = arith.constant 0 : i32
    return %c0_i32, %c0_i32_0 : i32, i32
  }
}

</mosaic_0001>

<bundles_post_ra>
// kernel: tpu_custom_call.1
= control target key start
LH: loop header
LB: loop body
LE: loop exit
PB: predicated region body
PF: predicated region fallthrough
CT: control target
= control target key end

     0   :  { %6 = vsyncpa [#allocation4], 0  ;;  %s142_s0 = inlined_call_operand.hbm [shape: f32[8,128], index: 0, kind: input, shape index: {}]   ;;  %s143_s1 = inlined_call_operand.hbm [shape: f32[1,1], index: 1, kind: output, shape index: {}]  }
   0x1   :  { %7 = vsyncpa [#allocation5], 0  ;;  %s106_s6 = smov [#allocation3]   ;;  %s70_s10 = scalar_lea.hbm %s142_s0, 128 }
   0x2   :  { %s14_s7 = sshll.u32 %s106_s6, 4  ;;  %p71_p0 = scmp.ne.s32.totalorder %s142_s0, %s70_s10  ;;  %s15_s7 = int_to_ptr.vmem [resolvable:$true] %s14_s7 }
   0x3   :  { %p74_p1 = scmp.lt.u32.totalorder %s70_s10, %s142_s0 }
   0x5   :  { %p76_p2 = pnand %p74_p1, %p71_p0 }
   0x7   :  { %79 = shalt.err (!%p76_p2)
}
   0x8   :  { %s80_s15 = scalar_lea.vmem %s15_s7, 128  ;;  %p85_p4 = scmp.lt.s32.totalorder %s15_s7, %s15_s7 }
   0x9   :  { %p81_p3 = scmp.ne.s32.totalorder %s15_s7, %s80_s15  ;;  %p86_p5 = scmp.lt.s32.totalorder %s80_s15, %s80_s15 }
   0xb   :  { %p87_p6 = por %p86_p5, %p85_p4 }
   0xd   :  { %p88_p7 = pnand %p87_p6, %p81_p3 }
   0xf   :  { %91 = shalt.err (!%p88_p7)
}
  0x10   :  { %17 = dma.hbm_to_vmem [thread:$0]  %s142_s0, 128, %s15_s7, [#allocation4]  }
  0x11   :  { %102 = dma.done.wait [#allocation4], 128  }
  0x12   :  { %103 = vsyncadd [#allocation4], 4294967168  ;;  %v26_v0 = vld [vmem:[#allocation3] sm:$0xff]  ;;  %s92_s21 = scalar_lea.hbm %s143_s1, 16 }
  0x13   :  { %68 = vlog2.f32 %v26_v0  ;;  %p93_p8 = scmp.ne.s32.totalorder %s143_s1, %s92_s21  ;;  %p96_p9 = scmp.lt.u32.totalorder %s92_s21, %s143_s1 }
  0x15   :  { %p98_p10 = pnand %p96_p9, %p93_p8 }
  0x1d   :  { %v69_v1 = vpop.eup %68 }
  0x1e   :  { %v29_v2 = vmul.f32 0.6931472, %v69_v1 }
  0x20   :  { %v30_v3 = vsub.f32 0.0, %v29_v2 }
  0x22   :  { %v31_v4 = vmin.f32 %v30_v3, 100.0 }
  0x24   :  { %38 = vadd.xlane.f32.xlu0 %v31_v4 }
  0xb1   :  { %v39_v5 = vpop.xlane.xlu0 %38 }
  0xb2   :  { %v40_v6 = vrot.slane %v39_v5, 4 }
  0xb4   :  { %v41_v7 = vadd.f32 %v40_v6, %v39_v5 }
  0xb6   :  { %v42_v8 = vrot.slane %v41_v7, 2 }
  0xb8   :  { %v43_v9 = vadd.f32 %v42_v8, %v41_v7 }
  0xba   :  { %v44_v10 = vrot.slane %v43_v9, 1 }
  0xbc   :  { %v45_v11 = vadd.f32 %v44_v10, %v43_v9 }
  0xbe   :  { %64 = vpush %v45_v11 }
  0xef   :  { %s65_s18 = spop %64 }
  0xf0   :  { %s47_s19 = smul.f32 0.001953125, %s65_s18 }
  0xf2   :  { %49 = sst [smem:[#allocation6]] %s47_s19 }
  0xf3   :  { %101 = shalt.err (!%p98_p10)
}
  0xf4   :  { %s107_s26 = smov [#allocation6]  }
  0xf5   :  { %57 = dma.smem_to_hbm %s107_s26, 16, %s143_s1, [#allocation5]  }
  0xf6   :  { %104 = dma.done.wait [#allocation5], 16  }
  0xf7   :  { %105 = vsyncadd [#allocation5], 4294967280 }
  0xf8   :  { %61 = sfence }
  0xf9   :  { %62 = vsyncpa [#allocation4], 1 }
  0xfa   :  { %63 = vsyncpa [#allocation5], 1 }

</bundles_post_ra>
